<compile_context>
chip_gen: v5e
topology: v5e:2x2
jax: 0.10.0
libtpu: 0.0.40
codegen_flags: <defaults>
</compile_context>

<pallas_src>
import math
from functools import partial

import jax
import jax.numpy as jnp
from jax import lax
from jax.experimental import pallas as pl
from jax.experimental.pallas import tpu as pltpu


# Contract the last dim of BOTH operands: q (S, dh) x k (tk, dh) -> (S, tk).
_NT_DIMS = (((1,), (1,)), ((), ()))


def _pick_head_group(n_heads: int, d_head: int) -> int:
    """Largest divisor G of n_heads with G * d_head <= 128 (lane-dense group width)."""
    gmax = max(1, min(n_heads, 128 // max(1, d_head)))
    for g in range(gmax, 0, -1):
        if n_heads % g == 0:
            return g
    return 1


def _pick_kv_tile(seq: int) -> int:
    """Key/value tile length for the online-softmax loop."""
    if seq <= 512:
        return seq
    for cand in (512, 256, 128):
        if seq % cand == 0:
            return cand
    return seq


def _self_attention_kernel(x_ref, wq_ref, bq_ref, wkv_ref, bkv_ref, wo_ref, bo_ref,
                           o_ref,
                           q_scr, m_scr, l_scr, acc_scr, obuf_scr,
                           *, n_groups: int, group: int, d_head: int, kv_tile: int,
                           causal: bool, cdtype):
    hg = pl.program_id(1)              # head-group index
    kv = pl.program_id(2)              # key/value tile index
    n_kv = pl.num_programs(2)

    S = x_ref.shape[1]
    D = x_ref.shape[2]
    Dg = group * d_head
    scale = 1.0 / math.sqrt(d_head)

    # ---- head-group start: fused q projection (one lane-dense matmul, N = Dg) and
    #      reset of the online-softmax running state.  Scale is folded into q once.
    @pl.when(kv == 0)
    def _():
        x = x_ref[0].astype(cdtype)                                   # (S, D)
        q = jnp.dot(x, wq_ref[hg].astype(cdtype),
                    preferred_element_type=jnp.float32) + bq_ref[hg]  # (S, Dg)
        q_scr[...] = (q * scale).astype(cdtype)
        m_scr[...] = jnp.full_like(m_scr, -jnp.inf)
        l_scr[...] = jnp.zeros_like(l_scr)
        acc_scr[...] = jnp.zeros_like(acc_scr)

    # ---- fused k|v projection for this kv tile (one matmul, N = 2*Dg).
    row0 = pl.multiple_of(kv * kv_tile, kv_tile)
    x_kv = x_ref[0, pl.ds(row0, kv_tile), :].astype(cdtype)           # (tk, D)
    kv_p = (jnp.dot(x_kv, wkv_ref[hg].astype(cdtype),
                    preferred_element_type=jnp.float32)
            + bkv_ref[hg]).astype(cdtype)                             # (tk, 2*Dg) = [k | v]

    # Causal mask for this kv tile (hoisted; shared by every head of the group).
    if causal:
        rows = lax.broadcasted_iota(jnp.int32, (S, kv_tile), 0)
        cols = lax.broadcasted_iota(jnp.int32, (S, kv_tile), 1) + kv * kv_tile
        masked = cols > rows

    # ---- per-head online softmax (short statically-unrolled loop over the group).
    for g in range(group):
        q_g = q_scr[:, g * d_head:(g + 1) * d_head]                   # (S, dh), pre-scaled
        k_g = kv_p[:, g * d_head:(g + 1) * d_head]                    # (tk, dh)
        v_g = kv_p[:, Dg + g * d_head:Dg + (g + 1) * d_head]          # (tk, dh)

        # scores = q @ k^T without materializing k^T ("NT" dot).
        s = lax.dot_general(q_g, k_g, _NT_DIMS,
                            preferred_element_type=jnp.float32)       # (S, tk)
        if causal:
            s = jnp.where(masked, -jnp.inf, s)

        m_prev = m_scr[g]                                             # (S, 1)
        m_new = jnp.maximum(m_prev, jnp.max(s, axis=-1, keepdims=True))
        alpha = jnp.exp(m_prev - m_new)
        p = jnp.exp(s - m_new)                                        # (S, tk)
        l_scr[g] = alpha * l_scr[g] + jnp.sum(p, axis=-1, keepdims=True)
        acc_scr[g] = alpha * acc_scr[g] + jnp.dot(
            p.astype(cdtype), v_g, preferred_element_type=jnp.float32)
        m_scr[g] = m_new

    # ---- head-group end: deferred normalization (divide touches only (S,1) vectors,
    #      reciprocal on the EUP) and park the group's (S, Dg) slab of head outputs.
    @pl.when(kv == n_kv - 1)
    def _():
        outs = [(acc_scr[g] * pl.reciprocal(l_scr[g], approx=True)).astype(cdtype)
                for g in range(group)]
        obuf_scr[hg] = jnp.concatenate(outs, axis=-1) if group > 1 else outs[0]

    # ---- last group, last kv tile: single deferred output projection over ALL heads
    #      against the VMEM-resident w_out (HG dots with K = Dg instead of H dots
    #      with K = d_head + H f32 read-modify-writes).
    @pl.when(jnp.logical_and(hg == pl.num_programs(1) - 1, kv == n_kv - 1))
    def _():
        out = jnp.broadcast_to(bo_ref[...], (S, D)).astype(jnp.float32)
        for g2 in range(n_groups):
            out = out + jnp.dot(obuf_scr[g2],
                                wo_ref[g2 * Dg:(g2 + 1) * Dg, :].astype(cdtype),
                                preferred_element_type=jnp.float32)
        o_ref[0] = out.astype(o_ref.dtype)


def self_attention(x, w_in, b_in, w_out, b_out, *, n_heads: int,
                   causal_mask: bool = False, mxu_dtype=None):
    """x: (B, S, D).  w_in: (D, 3D) in `x @ W` layout; b_in: (3D,);
    w_out: (D, D); b_out: (D,).  `mxu_dtype=jnp.bfloat16` casts MXU operands
    (accumulation stays f32)."""
    B, S, D = x.shape
    assert D % n_heads == 0
    H = n_heads
    dh = D // H
    G = _pick_head_group(H, dh)        # heads per group (lane-dense group width)
    HG = H // G                        # number of head groups
    Dg = G * dh
    tk = _pick_kv_tile(S)
    assert S % tk == 0
    n_kv = S // tk
    cdtype = jnp.dtype(mxu_dtype) if mxu_dtype is not None else x.dtype

    # One-time host-side weight rearrangement into per-group contiguous blocks
    # (done at parameter-load time in a real model):
    #   w_in (D, 3D) column order is [q | k | v], head-major inside each section.
    w_in_r = w_in.reshape(D, 3, HG, G, dh).transpose(2, 0, 1, 3, 4)   # (HG, D, 3, G, dh)
    w_q_r = w_in_r[:, :, 0].reshape(HG, D, Dg)                        # (HG, D, Dg)
    w_kv_r = w_in_r[:, :, 1:].reshape(HG, D, 2 * Dg)                  # (HG, D, 2*Dg)  [k | v]
    b_in_r = b_in.reshape(3, HG, G, dh).transpose(1, 0, 2, 3)         # (HG, 3, G, dh)
    b_q_r = b_in_r[:, 0].reshape(HG, 1, Dg)
    b_kv_r = b_in_r[:, 1:].reshape(HG, 1, 2 * Dg)
    b_out_r = b_out.reshape(1, D)

    kernel = partial(_self_attention_kernel, n_groups=HG, group=G, d_head=dh,
                     kv_tile=tk, causal=causal_mask, cdtype=cdtype)

    flops = (2 * B * S * D * 3 * D                 # qkv projection
             + 4 * B * H * S * S * dh              # QK^T and PV matmuls
             + 2 * B * S * D * D)                  # output projection
    transcendentals = B * H * S * S                # softmax exps
    bytes_accessed = int(2 * x.size * x.dtype.itemsize
                         + (w_in.size + b_in.size + w_out.size + b_out.size)
                         * w_in.dtype.itemsize)    # weights fetched once (resident)

    # Generation-aware VMEM budget: ~75% of physical, capped at 100 MiB
    # (=> ~48 MiB on v7x, ~96 MiB on v5e/v6e).
    try:
        vmem_cap = int(pltpu.get_tpu_info().vmem_capacity_bytes)
    except Exception:
        vmem_cap = 64 * 1024 * 1024
    vmem_limit = min(int(0.75 * vmem_cap), 100 * 1024 * 1024)

    return pl.pallas_call(
        kernel,
        out_shape=jax.ShapeDtypeStruct((B, S, D), x.dtype),
        grid_spec=pltpu.PrefetchScalarGridSpec(
            num_scalar_prefetch=0,
            grid=(B, HG, n_kv),
            in_specs=[
                # x: constant within (hg, kv) -> DMA'd once per batch step.
                pl.BlockSpec((1, S, D), lambda b, hg, kv: (b, 0, 0)),
                # All weights/biases: constant-index full blocks -> fetched once, resident.
                pl.BlockSpec((HG, D, Dg), lambda b, hg, kv: (0, 0, 0)),       # W_q
                pl.BlockSpec((HG, 1, Dg), lambda b, hg, kv: (0, 0, 0)),       # b_q
                pl.BlockSpec((HG, D, 2 * Dg), lambda b, hg, kv: (0, 0, 0)),   # W_kv
                pl.BlockSpec((HG, 1, 2 * Dg), lambda b, hg, kv: (0, 0, 0)),   # b_kv
                pl.BlockSpec((D, D), lambda b, hg, kv: (0, 0)),               # W_out
                pl.BlockSpec((1, D), lambda b, hg, kv: (0, 0)),               # b_out
            ],
            out_specs=pl.BlockSpec((1, S, D), lambda b, hg, kv: (b, 0, 0)),
            scratch_shapes=[
                pltpu.VMEM((S, Dg), cdtype),              # per-group pre-scaled q
                pltpu.VMEM((G, S, 1), jnp.float32),       # online-softmax running max
                pltpu.VMEM((G, S, 1), jnp.float32),       # online-softmax running sum
                pltpu.VMEM((G, S, dh), jnp.float32),      # online-softmax PV accumulator
                pltpu.VMEM((HG, S, Dg), cdtype),          # concat head outputs (pre out-proj)
            ],
        ),
        compiler_params=pltpu.CompilerParams(
            dimension_semantics=("parallel", "arbitrary", "arbitrary"),
            vmem_limit_bytes=vmem_limit,
        ),
        cost_estimate=pl.CostEstimate(
            flops=flops, transcendentals=transcendentals, bytes_accessed=bytes_accessed),
    )(x, w_q_r, b_q_r, w_kv_r, b_kv_r, w_out, b_out_r)


def reference_self_attention(x, w_in, b_in, w_out, b_out, *, n_heads: int,
                             causal_mask: bool = False):
    """Pure-JAX reference mirroring the PyTorch forward exactly."""
    B, S, D = x.shape
    d_head = D // n_heads
    qkv = x @ w_in + b_in                              # (B, S, 3D)
    q, k, v = jnp.split(qkv, 3, axis=-1)

    def heads(t):
        return t.reshape(B, S, n_heads, d_head).transpose(0, 2, 1, 3)  # (B, H, S, dh)

    q, k, v = heads(q), heads(k), heads(v)
    w = jnp.einsum("bhqd,bhkd->bhqk", q, k)
    if causal_mask:
        row = jnp.arange(S)[:, None]
        col = jnp.arange(S)[None, :]
        w = jnp.where(col > row, -jnp.inf, w)
    w = w / math.sqrt(d_head)
    w = jax.nn.softmax(w, axis=-1)
    out = jnp.einsum("bhqk,bhkd->bhqd", w, v)
    out = out.transpose(0, 2, 1, 3).reshape(B, S, D)
    return out @ w_out + b_out


if __name__ == "__main__":
    key = jax.random.PRNGKey(0)

    def make_params(k, D):
        k1, k2, k3, k4 = jax.random.split(k, 4)
        bound = 1.0 / math.sqrt(D)
        w_in = jax.random.uniform(k1, (D, 3 * D), minval=-bound, maxval=bound, dtype=jnp.float32)
        b_in = jax.random.uniform(k2, (3 * D,), minval=-bound, maxval=bound, dtype=jnp.float32)
        w_out = jax.random.uniform(k3, (D, D), minval=-bound, maxval=bound, dtype=jnp.float32)
        b_out = jax.random.uniform(k4, (D,), minval=-bound, maxval=bound, dtype=jnp.float32)
        return w_in, b_in, w_out, b_out

    # --- Small config from the module spec: batch=2, seq=8, d_embed=32, 4 heads.
    kx, kp = jax.random.split(key)
    B, S, D, H = 2, 8, 32, 4
    x = jax.random.normal(kx, (B, S, D), dtype=jnp.float32)
    w_in, b_in, w_out, b_out = make_params(kp, D)

    for causal in (True, False):
        out = jax.block_until_ready(
            self_attention(x, w_in, b_in, w_out, b_out, n_heads=H, causal_mask=causal))
        ref = reference_self_attention(x, w_in, b_in, w_out, b_out, n_heads=H,
                                       causal_mask=causal)
        assert out.shape == (B, S, D)
        assert jnp.allclose(out, ref, atol=5e-3, rtol=5e-3), f"mismatch (causal={causal})"

    # --- bf16-MXU operand path (f32 I/O, f32 accumulation), looser tolerance.
    out_bf16 = jax.block_until_ready(
        self_attention(x, w_in, b_in, w_out, b_out, n_heads=H, causal_mask=True,
                       mxu_dtype=jnp.bfloat16))
    ref_c = reference_self_attention(x, w_in, b_in, w_out, b_out, n_heads=H, causal_mask=True)
    assert jnp.allclose(out_bf16, ref_c, atol=5e-2, rtol=5e-2), "mismatch (bf16 MXU)"

    # --- Larger config exercising multiple head groups (HG=2) and kv tiles (online softmax).
    kx2, kp2 = jax.random.split(kp)
    B2, S2, D2, H2 = 2, 1024, 256, 4
    x2 = jax.random.normal(kx2, (B2, S2, D2), dtype=jnp.float32)
    w_in2, b_in2, w_out2, b_out2 = make_params(kp2, D2)
    out2 = jax.block_until_ready(
        self_attention(x2, w_in2, b_in2, w_out2, b_out2, n_heads=H2, causal_mask=True))
    ref2 = reference_self_attention(x2, w_in2, b_in2, w_out2, b_out2, n_heads=H2,
                                    causal_mask=True)
    assert out2.shape == (B2, S2, D2)
    assert jnp.allclose(out2, ref2, atol=5e-3, rtol=5e-3), "mismatch (large config)"

    print("KERNEL_OK")
</pallas_src>

<mosaic_0001>
module attributes {stable_mosaic.version = 11 : i64} {
  func.func @_self_attention_kernel(%arg0: i32, %arg1: i32, %arg2: i32, %arg3: memref<1x8x32xf32, #tpu.memory_space<vmem>>, %arg4: memref<1x32x32xf32, #tpu.memory_space<vmem>>, %arg5: memref<1x1x32xf32, #tpu.memory_space<vmem>>, %arg6: memref<1x32x64xf32, #tpu.memory_space<vmem>>, %arg7: memref<1x1x64xf32, #tpu.memory_space<vmem>>, %arg8: memref<32x32xf32, #tpu.memory_space<vmem>>, %arg9: memref<1x32xf32, #tpu.memory_space<vmem>>, %arg10: memref<1x8x32xf32, #tpu.memory_space<vmem>>, %arg11: memref<8x32xf32, #tpu.memory_space<vmem>>, %arg12: memref<4x8x1xf32, #tpu.memory_space<vmem>>, %arg13: memref<4x8x1xf32, #tpu.memory_space<vmem>>, %arg14: memref<4x8x8xf32, #tpu.memory_space<vmem>>, %arg15: memref<1x8x32xf32, #tpu.memory_space<vmem>>) attributes {dimension_semantics = [#tpu.dimension_semantics<parallel>, #tpu.dimension_semantics<arbitrary>, #tpu.dimension_semantics<arbitrary>], iteration_bounds = array<i64: 2, 1, 1>, scalar_prefetch = 0 : i64, scratch_operands = 5 : i64, tpu.core_type = #tpu.core_type<tc>, window_params = [{transform_indices = @transform_0, window_bounds = array<i64: 1, 8, 32>}, {pipeline_mode = #tpu.pipeline_mode<synchronous>, transform_indices = @transform_1, window_bounds = array<i64: 1, 32, 32>}, {pipeline_mode = #tpu.pipeline_mode<synchronous>, transform_indices = @transform_2, window_bounds = array<i64: 1, 1, 32>}, {pipeline_mode = #tpu.pipeline_mode<synchronous>, transform_indices = @transform_3, window_bounds = array<i64: 1, 32, 64>}, {pipeline_mode = #tpu.pipeline_mode<synchronous>, transform_indices = @transform_4, window_bounds = array<i64: 1, 1, 64>}, {pipeline_mode = #tpu.pipeline_mode<synchronous>, transform_indices = @transform_5, window_bounds = array<i64: 32, 32>}, {pipeline_mode = #tpu.pipeline_mode<synchronous>, transform_indices = @transform_6, window_bounds = array<i64: 1, 32>}, {transform_indices = @transform_7, window_bounds = array<i64: 1, 8, 32>}]} {
    %c0_i32 = arith.constant 0 : i32
    %0 = arith.cmpi eq, %arg2, %c0_i32 : i32
    %1 = arith.extui %0 : i1 to i32
    %c0_i32_0 = arith.constant 0 : i32
    %2 = arith.cmpi ne, %1, %c0_i32_0 : i32
    scf.if %2 {
      %c0_106 = arith.constant 0 : index
      %c0_107 = arith.constant 0 : index
      %c0_108 = arith.constant 0 : index
      %179 = vector.load %arg3[%c0_106, %c0_107, %c0_108] : memref<1x8x32xf32, #tpu.memory_space<vmem>>, vector<1x8x32xf32>
      %180 = vector.shape_cast %179 : vector<1x8x32xf32> to vector<8x32xf32>
      %181 = arith.index_cast %arg1 : i32 to index
      %c0_109 = arith.constant 0 : index
      %c0_110 = arith.constant 0 : index
      %182 = vector.load %arg4[%181, %c0_109, %c0_110] : memref<1x32x32xf32, #tpu.memory_space<vmem>>, vector<1x32x32xf32>
      %183 = vector.shape_cast %182 : vector<1x32x32xf32> to vector<32x32xf32>
      %cst_111 = arith.constant dense<0.000000e+00> : vector<8x32xf32>
      %184 = tpu.matmul %180, %183, %cst_111 {dimension_numbers = #tpu.dot_dimension_numbers<[1], [0], [0], [1], [0, 0, 1, 1], [], []>} : vector<8x32xf32>, vector<32x32xf32>, vector<8x32xf32> -> vector<8x32xf32>
      %185 = arith.index_cast %arg1 : i32 to index
      %c0_112 = arith.constant 0 : index
      %c0_113 = arith.constant 0 : index
      %186 = vector.load %arg5[%185, %c0_112, %c0_113] : memref<1x1x32xf32, #tpu.memory_space<vmem>>, vector<1x1x32xf32>
      %187 = vector.shape_cast %186 : vector<1x1x32xf32> to vector<1x32xf32>
      %188 = vector.broadcast %187 : vector<1x32xf32> to vector<8x32xf32>
      %189 = arith.addf %184, %188 : vector<8x32xf32>
      %cst_114 = arith.constant 0.353553385 : f32
      %190 = vector.broadcast %cst_114 : f32 to vector<8x32xf32>
      %191 = arith.mulf %189, %190 : vector<8x32xf32>
      %c0_115 = arith.constant 0 : index
      %c0_116 = arith.constant 0 : index
      %192 = vector.load %arg11[%c0_115, %c0_116] : memref<8x32xf32, #tpu.memory_space<vmem>>, vector<8x32xf32>
      tpu.vector_store %arg11[%c0_115, %c0_116], %191 {strides = array<i32>} : memref<8x32xf32, #tpu.memory_space<vmem>>, vector<8x32xf32>,
      %cst_117 = arith.constant 0xFF800000 : f32
      %193 = vector.broadcast %cst_117 : f32 to vector<4x8x1xf32>
      %c0_118 = arith.constant 0 : index
      %c0_119 = arith.constant 0 : index
      %c0_120 = arith.constant 0 : index
      %194 = vector.load %arg12[%c0_118, %c0_119, %c0_120] : memref<4x8x1xf32, #tpu.memory_space<vmem>>, vector<4x8x1xf32>
      tpu.vector_store %arg12[%c0_118, %c0_119, %c0_120], %193 {strides = array<i32>} : memref<4x8x1xf32, #tpu.memory_space<vmem>>, vector<4x8x1xf32>,
      %cst_121 = arith.constant 0.000000e+00 : f32
      %195 = vector.broadcast %cst_121 : f32 to vector<4x8x1xf32>
      %c0_122 = arith.constant 0 : index
      %c0_123 = arith.constant 0 : index
      %c0_124 = arith.constant 0 : index
      %196 = vector.load %arg13[%c0_122, %c0_123, %c0_124] : memref<4x8x1xf32, #tpu.memory_space<vmem>>, vector<4x8x1xf32>
      tpu.vector_store %arg13[%c0_122, %c0_123, %c0_124], %195 {strides = array<i32>} : memref<4x8x1xf32, #tpu.memory_space<vmem>>, vector<4x8x1xf32>,
      %cst_125 = arith.constant 0.000000e+00 : f32
      %197 = vector.broadcast %cst_125 : f32 to vector<4x8x8xf32>
      %c0_126 = arith.constant 0 : index
      %c0_127 = arith.constant 0 : index
      %c0_128 = arith.constant 0 : index
      %198 = vector.load %arg14[%c0_126, %c0_127, %c0_128] : memref<4x8x8xf32, #tpu.memory_space<vmem>>, vector<4x8x8xf32>
      tpu.vector_store %arg14[%c0_126, %c0_127, %c0_128], %197 {strides = array<i32>} : memref<4x8x8xf32, #tpu.memory_space<vmem>>, vector<4x8x8xf32>,
    } else {
    }
    %c8_i32 = arith.constant 8 : i32
    %3 = arith.muli %arg2, %c8_i32 : i32
    %4 = tpu.assume_multiple %3, 8 : i32
    %c0 = arith.constant 0 : index
    %5 = arith.index_cast %4 : i32 to index
    %c0_1 = arith.constant 0 : index
    %6 = vector.load %arg3[%c0, %5, %c0_1] : memref<1x8x32xf32, #tpu.memory_space<vmem>>, vector<1x8x32xf32>
    %7 = vector.shape_cast %6 : vector<1x8x32xf32> to vector<8x32xf32>
    %8 = arith.index_cast %arg1 : i32 to index
    %c0_2 = arith.constant 0 : index
    %c0_3 = arith.constant 0 : index
    %9 = vector.load %arg6[%8, %c0_2, %c0_3] : memref<1x32x64xf32, #tpu.memory_space<vmem>>, vector<1x32x64xf32>
    %10 = vector.shape_cast %9 : vector<1x32x64xf32> to vector<32x64xf32>
    %cst = arith.constant dense<0.000000e+00> : vector<8x64xf32>
    %11 = tpu.matmul %7, %10, %cst {dimension_numbers = #tpu.dot_dimension_numbers<[1], [0], [0], [1], [0, 0, 1, 1], [], []>} : vector<8x32xf32>, vector<32x64xf32>, vector<8x64xf32> -> vector<8x64xf32>
    %12 = arith.index_cast %arg1 : i32 to index
    %c0_4 = arith.constant 0 : index
    %c0_5 = arith.constant 0 : index
    %13 = vector.load %arg7[%12, %c0_4, %c0_5] : memref<1x1x64xf32, #tpu.memory_space<vmem>>, vector<1x1x64xf32>
    %14 = vector.shape_cast %13 : vector<1x1x64xf32> to vector<1x64xf32>
    %15 = vector.broadcast %14 : vector<1x64xf32> to vector<8x64xf32>
    %16 = arith.addf %11, %15 : vector<8x64xf32>
    %17 = tpu.iota {dimensions = array<i32: 0>} : vector<8x8xi32>
    %18 = tpu.iota {dimensions = array<i32: 1>} : vector<8x8xi32>
    %c8_i32_6 = arith.constant 8 : i32
    %19 = arith.muli %arg2, %c8_i32_6 : i32
    %20 = vector.broadcast %19 : i32 to vector<8x8xi32>
    %21 = arith.addi %18, %20 : vector<8x8xi32>
    %22 = arith.cmpi sgt, %21, %17 : vector<8x8xi32>
    %c0_7 = arith.constant 0 : index
    %c0_8 = arith.constant 0 : index
    %23 = vector.load %arg11[%c0_7, %c0_8] : memref<8x32xf32, #tpu.memory_space<vmem>>, vector<8x8xf32>
    %24 = vector.extract_strided_slice %16 {offsets = [0, 0], sizes = [8, 8], strides = [1, 1]} : vector<8x64xf32> to vector<8x8xf32>
    %25 = vector.extract_strided_slice %16 {offsets = [0, 32], sizes = [8, 8], strides = [1, 1]} : vector<8x64xf32> to vector<8x8xf32>
    %cst_9 = arith.constant dense<0.000000e+00> : vector<8x8xf32>
    %26 = tpu.matmul %23, %24, %cst_9 {dimension_numbers = #tpu.dot_dimension_numbers<[1], [1], [0], [0], [0, 0, 1, 0], [], []>} : vector<8x8xf32>, vector<8x8xf32>, vector<8x8xf32> -> vector<8x8xf32>
    %cst_10 = arith.constant 0xFF800000 : f32
    %27 = vector.broadcast %cst_10 : f32 to vector<8x8xf32>
    %28 = arith.select %22, %27, %26 : vector<8x8xi1>, vector<8x8xf32>
    %c0_11 = arith.constant 0 : index
    %c0_12 = arith.constant 0 : index
    %c0_13 = arith.constant 0 : index
    %29 = vector.load %arg12[%c0_11, %c0_12, %c0_13] : memref<4x8x1xf32, #tpu.memory_space<vmem>>, vector<1x8x1xf32>
    %30 = vector.shape_cast %29 : vector<1x8x1xf32> to vector<8x1xf32>
    %cst_14 = arith.constant dense<0xFF800000> : vector<8xf32>
    %31 = vector.multi_reduction <maximumf>, %28, %cst_14 [1] : vector<8x8xf32> to vector<8xf32>
    %32 = vector.shape_cast %31 : vector<8xf32> to vector<8x1xf32>
    %33 = arith.maximumf %30, %32 : vector<8x1xf32>
    %34 = arith.subf %30, %33 : vector<8x1xf32>
    %35 = math.exp %34 : vector<8x1xf32>
    %36 = vector.broadcast %33 : vector<8x1xf32> to vector<8x8xf32>
    %37 = arith.subf %28, %36 : vector<8x8xf32>
    %38 = math.exp %37 : vector<8x8xf32>
    %c0_15 = arith.constant 0 : index
    %c0_16 = arith.constant 0 : index
    %c0_17 = arith.constant 0 : index
    %39 = vector.load %arg13[%c0_15, %c0_16, %c0_17] : memref<4x8x1xf32, #tpu.memory_space<vmem>>, vector<1x8x1xf32>
    %40 = vector.shape_cast %39 : vector<1x8x1xf32> to vector<8x1xf32>
    %41 = arith.mulf %35, %40 : vector<8x1xf32>
    %cst_18 = arith.constant dense<0.000000e+00> : vector<8xf32>
    %42 = vector.multi_reduction <add>, %38, %cst_18 [1] : vector<8x8xf32> to vector<8xf32>
    %43 = vector.shape_cast %42 : vector<8xf32> to vector<8x1xf32>
    %44 = arith.addf %41, %43 : vector<8x1xf32>
    %c0_19 = arith.constant 0 : index
    %c0_20 = arith.constant 0 : index
    %c0_21 = arith.constant 0 : index
    %45 = vector.load %arg13[%c0_19, %c0_20, %c0_21] : memref<4x8x1xf32, #tpu.memory_space<vmem>>, vector<1x8x1xf32>
    %46 = vector.shape_cast %45 : vector<1x8x1xf32> to vector<8x1xf32>
    %47 = vector.shape_cast %44 : vector<8x1xf32> to vector<1x8x1xf32>
    tpu.vector_store %arg13[%c0_19, %c0_20, %c0_21], %47 {strides = array<i32>} : memref<4x8x1xf32, #tpu.memory_space<vmem>>, vector<1x8x1xf32>,
    %c0_22 = arith.constant 0 : index
    %c0_23 = arith.constant 0 : index
    %c0_24 = arith.constant 0 : index
    %48 = vector.load %arg14[%c0_22, %c0_23, %c0_24] : memref<4x8x8xf32, #tpu.memory_space<vmem>>, vector<1x8x8xf32>
    %49 = vector.shape_cast %48 : vector<1x8x8xf32> to vector<8x8xf32>
    %50 = vector.broadcast %35 : vector<8x1xf32> to vector<8x8xf32>
    %51 = arith.mulf %50, %49 : vector<8x8xf32>
    %cst_25 = arith.constant dense<0.000000e+00> : vector<8x8xf32>
    %52 = tpu.matmul %38, %25, %cst_25 {dimension_numbers = #tpu.dot_dimension_numbers<[1], [0], [0], [1], [0, 0, 1, 1], [], []>} : vector<8x8xf32>, vector<8x8xf32>, vector<8x8xf32> -> vector<8x8xf32>
    %53 = arith.addf %51, %52 : vector<8x8xf32>
    %c0_26 = arith.constant 0 : index
    %c0_27 = arith.constant 0 : index
    %c0_28 = arith.constant 0 : index
    %54 = vector.load %arg14[%c0_26, %c0_27, %c0_28] : memref<4x8x8xf32, #tpu.memory_space<vmem>>, vector<1x8x8xf32>
    %55 = vector.shape_cast %54 : vector<1x8x8xf32> to vector<8x8xf32>
    %56 = vector.shape_cast %53 : vector<8x8xf32> to vector<1x8x8xf32>
    tpu.vector_store %arg14[%c0_26, %c0_27, %c0_28], %56 {strides = array<i32>} : memref<4x8x8xf32, #tpu.memory_space<vmem>>, vector<1x8x8xf32>,
    %c0_29 = arith.constant 0 : index
    %c0_30 = arith.constant 0 : index
    %c0_31 = arith.constant 0 : index
    %57 = vector.load %arg12[%c0_29, %c0_30, %c0_31] : memref<4x8x1xf32, #tpu.memory_space<vmem>>, vector<1x8x1xf32>
    %58 = vector.shape_cast %57 : vector<1x8x1xf32> to vector<8x1xf32>
    %59 = vector.shape_cast %33 : vector<8x1xf32> to vector<1x8x1xf32>
    tpu.vector_store %arg12[%c0_29, %c0_30, %c0_31], %59 {strides = array<i32>} : memref<4x8x1xf32, #tpu.memory_space<vmem>>, vector<1x8x1xf32>,
    %c0_32 = arith.constant 0 : index
    %c8 = arith.constant 8 : index
    %60 = vector.load %arg11[%c0_32, %c8] : memref<8x32xf32, #tpu.memory_space<vmem>>, vector<8x8xf32>
    %61 = vector.extract_strided_slice %16 {offsets = [0, 8], sizes = [8, 8], strides = [1, 1]} : vector<8x64xf32> to vector<8x8xf32>
    %62 = vector.extract_strided_slice %16 {offsets = [0, 40], sizes = [8, 8], strides = [1, 1]} : vector<8x64xf32> to vector<8x8xf32>
    %cst_33 = arith.constant dense<0.000000e+00> : vector<8x8xf32>
    %63 = tpu.matmul %60, %61, %cst_33 {dimension_numbers = #tpu.dot_dimension_numbers<[1], [1], [0], [0], [0, 0, 1, 0], [], []>} : vector<8x8xf32>, vector<8x8xf32>, vector<8x8xf32> -> vector<8x8xf32>
    %cst_34 = arith.constant 0xFF800000 : f32
    %64 = vector.broadcast %cst_34 : f32 to vector<8x8xf32>
    %65 = arith.select %22, %64, %63 : vector<8x8xi1>, vector<8x8xf32>
    %c1 = arith.constant 1 : index
    %c0_35 = arith.constant 0 : index
    %c0_36 = arith.constant 0 : index
    %66 = vector.load %arg12[%c1, %c0_35, %c0_36] : memref<4x8x1xf32, #tpu.memory_space<vmem>>, vector<1x8x1xf32>
    %67 = vector.shape_cast %66 : vector<1x8x1xf32> to vector<8x1xf32>
    %cst_37 = arith.constant dense<0xFF800000> : vector<8xf32>
    %68 = vector.multi_reduction <maximumf>, %65, %cst_37 [1] : vector<8x8xf32> to vector<8xf32>
    %69 = vector.shape_cast %68 : vector<8xf32> to vector<8x1xf32>
    %70 = arith.maximumf %67, %69 : vector<8x1xf32>
    %71 = arith.subf %67, %70 : vector<8x1xf32>
    %72 = math.exp %71 : vector<8x1xf32>
    %73 = vector.broadcast %70 : vector<8x1xf32> to vector<8x8xf32>
    %74 = arith.subf %65, %73 : vector<8x8xf32>
    %75 = math.exp %74 : vector<8x8xf32>
    %c1_38 = arith.constant 1 : index
    %c0_39 = arith.constant 0 : index
    %c0_40 = arith.constant 0 : index
    %76 = vector.load %arg13[%c1_38, %c0_39, %c0_40] : memref<4x8x1xf32, #tpu.memory_space<vmem>>, vector<1x8x1xf32>
    %77 = vector.shape_cast %76 : vector<1x8x1xf32> to vector<8x1xf32>
    %78 = arith.mulf %72, %77 : vector<8x1xf32>
    %cst_41 = arith.constant dense<0.000000e+00> : vector<8xf32>
    %79 = vector.multi_reduction <add>, %75, %cst_41 [1] : vector<8x8xf32> to vector<8xf32>
    %80 = vector.shape_cast %79 : vector<8xf32> to vector<8x1xf32>
    %81 = arith.addf %78, %80 : vector<8x1xf32>
    %c1_42 = arith.constant 1 : index
    %c0_43 = arith.constant 0 : index
    %c0_44 = arith.constant 0 : index
    %82 = vector.load %arg13[%c1_42, %c0_43, %c0_44] : memref<4x8x1xf32, #tpu.memory_space<vmem>>, vector<1x8x1xf32>
    %83 = vector.shape_cast %82 : vector<1x8x1xf32> to vector<8x1xf32>
    %84 = vector.shape_cast %81 : vector<8x1xf32> to vector<1x8x1xf32>
    tpu.vector_store %arg13[%c1_42, %c0_43, %c0_44], %84 {strides = array<i32>} : memref<4x8x1xf32, #tpu.memory_space<vmem>>, vector<1x8x1xf32>,
    %c1_45 = arith.constant 1 : index
    %c0_46 = arith.constant 0 : index
    %c0_47 = arith.constant 0 : index
    %85 = vector.load %arg14[%c1_45, %c0_46, %c0_47] : memref<4x8x8xf32, #tpu.memory_space<vmem>>, vector<1x8x8xf32>
    %86 = vector.shape_cast %85 : vector<1x8x8xf32> to vector<8x8xf32>
    %87 = vector.broadcast %72 : vector<8x1xf32> to vector<8x8xf32>
    %88 = arith.mulf %87, %86 : vector<8x8xf32>
    %cst_48 = arith.constant dense<0.000000e+00> : vector<8x8xf32>
    %89 = tpu.matmul %75, %62, %cst_48 {dimension_numbers = #tpu.dot_dimension_numbers<[1], [0], [0], [1], [0, 0, 1, 1], [], []>} : vector<8x8xf32>, vector<8x8xf32>, vector<8x8xf32> -> vector<8x8xf32>
    %90 = arith.addf %88, %89 : vector<8x8xf32>
    %c1_49 = arith.constant 1 : index
    %c0_50 = arith.constant 0 : index
    %c0_51 = arith.constant 0 : index
    %91 = vector.load %arg14[%c1_49, %c0_50, %c0_51] : memref<4x8x8xf32, #tpu.memory_space<vmem>>, vector<1x8x8xf32>
    %92 = vector.shape_cast %91 : vector<1x8x8xf32> to vector<8x8xf32>
    %93 = vector.shape_cast %90 : vector<8x8xf32> to vector<1x8x8xf32>
    tpu.vector_store %arg14[%c1_49, %c0_50, %c0_51], %93 {strides = array<i32>} : memref<4x8x8xf32, #tpu.memory_space<vmem>>, vector<1x8x8xf32>,
    %c1_52 = arith.constant 1 : index
    %c0_53 = arith.constant 0 : index
    %c0_54 = arith.constant 0 : index
    %94 = vector.load %arg12[%c1_52, %c0_53, %c0_54] : memref<4x8x1xf32, #tpu.memory_space<vmem>>, vector<1x8x1xf32>
    %95 = vector.shape_cast %94 : vector<1x8x1xf32> to vector<8x1xf32>
    %96 = vector.shape_cast %70 : vector<8x1xf32> to vector<1x8x1xf32>
    tpu.vector_store %arg12[%c1_52, %c0_53, %c0_54], %96 {strides = array<i32>} : memref<4x8x1xf32, #tpu.memory_space<vmem>>, vector<1x8x1xf32>,
    %c0_55 = arith.constant 0 : index
    %c16 = arith.constant 16 : index
    %97 = vector.load %arg11[%c0_55, %c16] : memref<8x32xf32, #tpu.memory_space<vmem>>, vector<8x8xf32>
    %98 = vector.extract_strided_slice %16 {offsets = [0, 16], sizes = [8, 8], strides = [1, 1]} : vector<8x64xf32> to vector<8x8xf32>
    %99 = vector.extract_strided_slice %16 {offsets = [0, 48], sizes = [8, 8], strides = [1, 1]} : vector<8x64xf32> to vector<8x8xf32>
    %cst_56 = arith.constant dense<0.000000e+00> : vector<8x8xf32>
    %100 = tpu.matmul %97, %98, %cst_56 {dimension_numbers = #tpu.dot_dimension_numbers<[1], [1], [0], [0], [0, 0, 1, 0], [], []>} : vector<8x8xf32>, vector<8x8xf32>, vector<8x8xf32> -> vector<8x8xf32>
    %cst_57 = arith.constant 0xFF800000 : f32
    %101 = vector.broadcast %cst_57 : f32 to vector<8x8xf32>
    %102 = arith.select %22, %101, %100 : vector<8x8xi1>, vector<8x8xf32>
    %c2 = arith.constant 2 : index
    %c0_58 = arith.constant 0 : index
    %c0_59 = arith.constant 0 : index
    %103 = vector.load %arg12[%c2, %c0_58, %c0_59] : memref<4x8x1xf32, #tpu.memory_space<vmem>>, vector<1x8x1xf32>
    %104 = vector.shape_cast %103 : vector<1x8x1xf32> to vector<8x1xf32>
    %cst_60 = arith.constant dense<0xFF800000> : vector<8xf32>
    %105 = vector.multi_reduction <maximumf>, %102, %cst_60 [1] : vector<8x8xf32> to vector<8xf32>
    %106 = vector.shape_cast %105 : vector<8xf32> to vector<8x1xf32>
    %107 = arith.maximumf %104, %106 : vector<8x1xf32>
    %108 = arith.subf %104, %107 : vector<8x1xf32>
    %109 = math.exp %108 : vector<8x1xf32>
    %110 = vector.broadcast %107 : vector<8x1xf32> to vector<8x8xf32>
    %111 = arith.subf %102, %110 : vector<8x8xf32>
    %112 = math.exp %111 : vector<8x8xf32>
    %c2_61 = arith.constant 2 : index
    %c0_62 = arith.constant 0 : index
    %c0_63 = arith.constant 0 : index
    %113 = vector.load %arg13[%c2_61, %c0_62, %c0_63] : memref<4x8x1xf32, #tpu.memory_space<vmem>>, vector<1x8x1xf32>
    %114 = vector.shape_cast %113 : vector<1x8x1xf32> to vector<8x1xf32>
    %115 = arith.mulf %109, %114 : vector<8x1xf32>
    %cst_64 = arith.constant dense<0.000000e+00> : vector<8xf32>
    %116 = vector.multi_reduction <add>, %112, %cst_64 [1] : vector<8x8xf32> to vector<8xf32>
    %117 = vector.shape_cast %116 : vector<8xf32> to vector<8x1xf32>
    %118 = arith.addf %115, %117 : vector<8x1xf32>
    %c2_65 = arith.constant 2 : index
    %c0_66 = arith.constant 0 : index
    %c0_67 = arith.constant 0 : index
    %119 = vector.load %arg13[%c2_65, %c0_66, %c0_67] : memref<4x8x1xf32, #tpu.memory_space<vmem>>, vector<1x8x1xf32>
    %120 = vector.shape_cast %119 : vector<1x8x1xf32> to vector<8x1xf32>
    %121 = vector.shape_cast %118 : vector<8x1xf32> to vector<1x8x1xf32>
    tpu.vector_store %arg13[%c2_65, %c0_66, %c0_67], %121 {strides = array<i32>} : memref<4x8x1xf32, #tpu.memory_space<vmem>>, vector<1x8x1xf32>,
    %c2_68 = arith.constant 2 : index
    %c0_69 = arith.constant 0 : index
    %c0_70 = arith.constant 0 : index
    %122 = vector.load %arg14[%c2_68, %c0_69, %c0_70] : memref<4x8x8xf32, #tpu.memory_space<vmem>>, vector<1x8x8xf32>
    %123 = vector.shape_cast %122 : vector<1x8x8xf32> to vector<8x8xf32>
    %124 = vector.broadcast %109 : vector<8x1xf32> to vector<8x8xf32>
    %125 = arith.mulf %124, %123 : vector<8x8xf32>
    %cst_71 = arith.constant dense<0.000000e+00> : vector<8x8xf32>
    %126 = tpu.matmul %112, %99, %cst_71 {dimension_numbers = #tpu.dot_dimension_numbers<[1], [0], [0], [1], [0, 0, 1, 1], [], []>} : vector<8x8xf32>, vector<8x8xf32>, vector<8x8xf32> -> vector<8x8xf32>
    %127 = arith.addf %125, %126 : vector<8x8xf32>
    %c2_72 = arith.constant 2 : index
    %c0_73 = arith.constant 0 : index
    %c0_74 = arith.constant 0 : index
    %128 = vector.load %arg14[%c2_72, %c0_73, %c0_74] : memref<4x8x8xf32, #tpu.memory_space<vmem>>, vector<1x8x8xf32>
    %129 = vector.shape_cast %128 : vector<1x8x8xf32> to vector<8x8xf32>
    %130 = vector.shape_cast %127 : vector<8x8xf32> to vector<1x8x8xf32>
    tpu.vector_store %arg14[%c2_72, %c0_73, %c0_74], %130 {strides = array<i32>} : memref<4x8x8xf32, #tpu.memory_space<vmem>>, vector<1x8x8xf32>,
    %c2_75 = arith.constant 2 : index
    %c0_76 = arith.constant 0 : index
    %c0_77 = arith.constant 0 : index
    %131 = vector.load %arg12[%c2_75, %c0_76, %c0_77] : memref<4x8x1xf32, #tpu.memory_space<vmem>>, vector<1x8x1xf32>
    %132 = vector.shape_cast %131 : vector<1x8x1xf32> to vector<8x1xf32>
    %133 = vector.shape_cast %107 : vector<8x1xf32> to vector<1x8x1xf32>
    tpu.vector_store %arg12[%c2_75, %c0_76, %c0_77], %133 {strides = array<i32>} : memref<4x8x1xf32, #tpu.memory_space<vmem>>, vector<1x8x1xf32>,
    %c0_78 = arith.constant 0 : index
    %c24 = arith.constant 24 : index
    %134 = vector.load %arg11[%c0_78, %c24] : memref<8x32xf32, #tpu.memory_space<vmem>>, vector<8x8xf32>
    %135 = vector.extract_strided_slice %16 {offsets = [0, 24], sizes = [8, 8], strides = [1, 1]} : vector<8x64xf32> to vector<8x8xf32>
    %136 = vector.extract_strided_slice %16 {offsets = [0, 56], sizes = [8, 8], strides = [1, 1]} : vector<8x64xf32> to vector<8x8xf32>
    %cst_79 = arith.constant dense<0.000000e+00> : vector<8x8xf32>
    %137 = tpu.matmul %134, %135, %cst_79 {dimension_numbers = #tpu.dot_dimension_numbers<[1], [1], [0], [0], [0, 0, 1, 0], [], []>} : vector<8x8xf32>, vector<8x8xf32>, vector<8x8xf32> -> vector<8x8xf32>
    %cst_80 = arith.constant 0xFF800000 : f32
    %138 = vector.broadcast %cst_80 : f32 to vector<8x8xf32>
    %139 = arith.select %22, %138, %137 : vector<8x8xi1>, vector<8x8xf32>
    %c3 = arith.constant 3 : index
    %c0_81 = arith.constant 0 : index
    %c0_82 = arith.constant 0 : index
    %140 = vector.load %arg12[%c3, %c0_81, %c0_82] : memref<4x8x1xf32, #tpu.memory_space<vmem>>, vector<1x8x1xf32>
    %141 = vector.shape_cast %140 : vector<1x8x1xf32> to vector<8x1xf32>
    %cst_83 = arith.constant dense<0xFF800000> : vector<8xf32>
    %142 = vector.multi_reduction <maximumf>, %139, %cst_83 [1] : vector<8x8xf32> to vector<8xf32>
    %143 = vector.shape_cast %142 : vector<8xf32> to vector<8x1xf32>
    %144 = arith.maximumf %141, %143 : vector<8x1xf32>
    %145 = arith.subf %141, %144 : vector<8x1xf32>
    %146 = math.exp %145 : vector<8x1xf32>
    %147 = vector.broadcast %144 : vector<8x1xf32> to vector<8x8xf32>
    %148 = arith.subf %139, %147 : vector<8x8xf32>
    %149 = math.exp %148 : vector<8x8xf32>
    %c3_84 = arith.constant 3 : index
    %c0_85 = arith.constant 0 : index
    %c0_86 = arith.constant 0 : index
    %150 = vector.load %arg13[%c3_84, %c0_85, %c0_86] : memref<4x8x1xf32, #tpu.memory_space<vmem>>, vector<1x8x1xf32>
    %151 = vector.shape_cast %150 : vector<1x8x1xf32> to vector<8x1xf32>
    %152 = arith.mulf %146, %151 : vector<8x1xf32>
    %cst_87 = arith.constant dense<0.000000e+00> : vector<8xf32>
    %153 = vector.multi_reduction <add>, %149, %cst_87 [1] : vector<8x8xf32> to vector<8xf32>
    %154 = vector.shape_cast %153 : vector<8xf32> to vector<8x1xf32>
    %155 = arith.addf %152, %154 : vector<8x1xf32>
    %c3_88 = arith.constant 3 : index
    %c0_89 = arith.constant 0 : index
    %c0_90 = arith.constant 0 : index
    %156 = vector.load %arg13[%c3_88, %c0_89, %c0_90] : memref<4x8x1xf32, #tpu.memory_space<vmem>>, vector<1x8x1xf32>
    %157 = vector.shape_cast %156 : vector<1x8x1xf32> to vector<8x1xf32>
    %158 = vector.shape_cast %155 : vector<8x1xf32> to vector<1x8x1xf32>
    tpu.vector_store %arg13[%c3_88, %c0_89, %c0_90], %158 {strides = array<i32>} : memref<4x8x1xf32, #tpu.memory_space<vmem>>, vector<1x8x1xf32>,
    %c3_91 = arith.constant 3 : index
    %c0_92 = arith.constant 0 : index
    %c0_93 = arith.constant 0 : index
    %159 = vector.load %arg14[%c3_91, %c0_92, %c0_93] : memref<4x8x8xf32, #tpu.memory_space<vmem>>, vector<1x8x8xf32>
    %160 = vector.shape_cast %159 : vector<1x8x8xf32> to vector<8x8xf32>
    %161 = vector.broadcast %146 : vector<8x1xf32> to vector<8x8xf32>
    %162 = arith.mulf %161, %160 : vector<8x8xf32>
    %cst_94 = arith.constant dense<0.000000e+00> : vector<8x8xf32>
    %163 = tpu.matmul %149, %136, %cst_94 {dimension_numbers = #tpu.dot_dimension_numbers<[1], [0], [0], [1], [0, 0, 1, 1], [], []>} : vector<8x8xf32>, vector<8x8xf32>, vector<8x8xf32> -> vector<8x8xf32>
    %164 = arith.addf %162, %163 : vector<8x8xf32>
    %c3_95 = arith.constant 3 : index
    %c0_96 = arith.constant 0 : index
    %c0_97 = arith.constant 0 : index
    %165 = vector.load %arg14[%c3_95, %c0_96, %c0_97] : memref<4x8x8xf32, #tpu.memory_space<vmem>>, vector<1x8x8xf32>
    %166 = vector.shape_cast %165 : vector<1x8x8xf32> to vector<8x8xf32>
    %167 = vector.shape_cast %164 : vector<8x8xf32> to vector<1x8x8xf32>
    tpu.vector_store %arg14[%c3_95, %c0_96, %c0_97], %167 {strides = array<i32>} : memref<4x8x8xf32, #tpu.memory_space<vmem>>, vector<1x8x8xf32>,
    %c3_98 = arith.constant 3 : index
    %c0_99 = arith.constant 0 : index
    %c0_100 = arith.constant 0 : index
    %168 = vector.load %arg12[%c3_98, %c0_99, %c0_100] : memref<4x8x1xf32, #tpu.memory_space<vmem>>, vector<1x8x1xf32>
    %169 = vector.shape_cast %168 : vector<1x8x1xf32> to vector<8x1xf32>
    %170 = vector.shape_cast %144 : vector<8x1xf32> to vector<1x8x1xf32>
    tpu.vector_store %arg12[%c3_98, %c0_99, %c0_100], %170 {strides = array<i32>} : memref<4x8x1xf32, #tpu.memory_space<vmem>>, vector<1x8x1xf32>,
    %c0_i32_101 = arith.constant 0 : i32
    %171 = arith.cmpi eq, %arg2, %c0_i32_101 : i32
    %172 = arith.extui %171 : i1 to i32
    %c0_i32_102 = arith.constant 0 : i32
    %173 = arith.cmpi ne, %172, %c0_i32_102 : i32
    scf.if %173 {
      %c0_106 = arith.constant 0 : index
      %c0_107 = arith.constant 0 : index
      %c0_108 = arith.constant 0 : index
      %179 = vector.load %arg14[%c0_106, %c0_107, %c0_108] : memref<4x8x8xf32, #tpu.memory_space<vmem>>, vector<1x8x8xf32>
      %180 = vector.shape_cast %179 : vector<1x8x8xf32> to vector<8x8xf32>
      %c0_109 = arith.constant 0 : index
      %c0_110 = arith.constant 0 : index
      %c0_111 = arith.constant 0 : index
      %181 = vector.load %arg13[%c0_109, %c0_110, %c0_111] : memref<4x8x1xf32, #tpu.memory_space<vmem>>, vector<1x8x1xf32>
      %182 = vector.shape_cast %181 : vector<1x8x1xf32> to vector<8x1xf32>
      %183 = tpu.reciprocal %182 {approx = true} : vector<8x1xf32> -> vector<8x1xf32>
      %184 = vector.broadcast %183 : vector<8x1xf32> to vector<8x8xf32>
      %185 = arith.mulf %180, %184 : vector<8x8xf32>
      %c1_112 = arith.constant 1 : index
      %c0_113 = arith.constant 0 : index
      %c0_114 = arith.constant 0 : index
      %186 = vector.load %arg14[%c1_112, %c0_113, %c0_114] : memref<4x8x8xf32, #tpu.memory_space<vmem>>, vector<1x8x8xf32>
      %187 = vector.shape_cast %186 : vector<1x8x8xf32> to vector<8x8xf32>
      %c1_115 = arith.constant 1 : index
      %c0_116 = arith.constant 0 : index
      %c0_117 = arith.constant 0 : index
      %188 = vector.load %arg13[%c1_115, %c0_116, %c0_117] : memref<4x8x1xf32, #tpu.memory_space<vmem>>, vector<1x8x1xf32>
      %189 = vector.shape_cast %188 : vector<1x8x1xf32> to vector<8x1xf32>
      %190 = tpu.reciprocal %189 {approx = true} : vector<8x1xf32> -> vector<8x1xf32>
      %191 = vector.broadcast %190 : vector<8x1xf32> to vector<8x8xf32>
      %192 = arith.mulf %187, %191 : vector<8x8xf32>
      %c2_118 = arith.constant 2 : index
      %c0_119 = arith.constant 0 : index
      %c0_120 = arith.constant 0 : index
      %193 = vector.load %arg14[%c2_118, %c0_119, %c0_120] : memref<4x8x8xf32, #tpu.memory_space<vmem>>, vector<1x8x8xf32>
      %194 = vector.shape_cast %193 : vector<1x8x8xf32> to vector<8x8xf32>
      %c2_121 = arith.constant 2 : index
      %c0_122 = arith.constant 0 : index
      %c0_123 = arith.constant 0 : index
      %195 = vector.load %arg13[%c2_121, %c0_122, %c0_123] : memref<4x8x1xf32, #tpu.memory_space<vmem>>, vector<1x8x1xf32>
      %196 = vector.shape_cast %195 : vector<1x8x1xf32> to vector<8x1xf32>
      %197 = tpu.reciprocal %196 {approx = true} : vector<8x1xf32> -> vector<8x1xf32>
      %198 = vector.broadcast %197 : vector<8x1xf32> to vector<8x8xf32>
      %199 = arith.mulf %194, %198 : vector<8x8xf32>
      %c3_124 = arith.constant 3 : index
      %c0_125 = arith.constant 0 : index
      %c0_126 = arith.constant 0 : index
      %200 = vector.load %arg14[%c3_124, %c0_125, %c0_126] : memref<4x8x8xf32, #tpu.memory_space<vmem>>, vector<1x8x8xf32>
      %201 = vector.shape_cast %200 : vector<1x8x8xf32> to vector<8x8xf32>
      %c3_127 = arith.constant 3 : index
      %c0_128 = arith.constant 0 : index
      %c0_129 = arith.constant 0 : index
      %202 = vector.load %arg13[%c3_127, %c0_128, %c0_129] : memref<4x8x1xf32, #tpu.memory_space<vmem>>, vector<1x8x1xf32>
      %203 = vector.shape_cast %202 : vector<1x8x1xf32> to vector<8x1xf32>
      %204 = tpu.reciprocal %203 {approx = true} : vector<8x1xf32> -> vector<8x1xf32>
      %205 = vector.broadcast %204 : vector<8x1xf32> to vector<8x8xf32>
      %206 = arith.mulf %201, %205 : vector<8x8xf32>
      %207 = tpu.concatenate %185, %192, %199, %206 in 1 : vector<8x8xf32>, vector<8x8xf32>, vector<8x8xf32>, vector<8x8xf32> -> vector<8x32xf32>
      %208 = arith.index_cast %arg1 : i32 to index
      %c0_130 = arith.constant 0 : index
      %c0_131 = arith.constant 0 : index
      %209 = vector.load %arg15[%208, %c0_130, %c0_131] : memref<1x8x32xf32, #tpu.memory_space<vmem>>, vector<1x8x32xf32>
      %210 = vector.shape_cast %209 : vector<1x8x32xf32> to vector<8x32xf32>
      %211 = vector.shape_cast %207 : vector<8x32xf32> to vector<1x8x32xf32>
      tpu.vector_store %arg15[%208, %c0_130, %c0_131], %211 {strides = array<i32>} : memref<1x8x32xf32, #tpu.memory_space<vmem>>, vector<1x8x32xf32>,
    } else {
    }
    %c0_i32_103 = arith.constant 0 : i32
    %174 = arith.cmpi eq, %arg1, %c0_i32_103 : i32
    %c0_i32_104 = arith.constant 0 : i32
    %175 = arith.cmpi eq, %arg2, %c0_i32_104 : i32
    %176 = arith.andi %174, %175 : i1
    %177 = arith.extui %176 : i1 to i32
    %c0_i32_105 = arith.constant 0 : i32
    %178 = arith.cmpi ne, %177, %c0_i32_105 : i32
    scf.if %178 {
      %c0_106 = arith.constant 0 : index
      %c0_107 = arith.constant 0 : index
      %179 = vector.load %arg9[%c0_106, %c0_107] : memref<1x32xf32, #tpu.memory_space<vmem>>, vector<1x32xf32>
      %180 = vector.shape_cast %179 : vector<1x32xf32> to vector<1x32xf32>
      %181 = vector.broadcast %180 : vector<1x32xf32> to vector<8x32xf32>
      %c0_108 = arith.constant 0 : index
      %c0_109 = arith.constant 0 : index
      %c0_110 = arith.constant 0 : index
      %182 = vector.load %arg15[%c0_108, %c0_109, %c0_110] : memref<1x8x32xf32, #tpu.memory_space<vmem>>, vector<1x8x32xf32>
      %183 = vector.shape_cast %182 : vector<1x8x32xf32> to vector<8x32xf32>
      %c0_111 = arith.constant 0 : index
      %c0_112 = arith.constant 0 : index
      %184 = vector.load %arg8[%c0_111, %c0_112] : memref<32x32xf32, #tpu.memory_space<vmem>>, vector<32x32xf32>
      %cst_113 = arith.constant dense<0.000000e+00> : vector<8x32xf32>
      %185 = tpu.matmul %183, %184, %cst_113 {dimension_numbers = #tpu.dot_dimension_numbers<[1], [0], [0], [1], [0, 0, 1, 1], [], []>} : vector<8x32xf32>, vector<32x32xf32>, vector<8x32xf32> -> vector<8x32xf32>
      %186 = arith.addf %181, %185 : vector<8x32xf32>
      %c0_114 = arith.constant 0 : index
      %c0_115 = arith.constant 0 : index
      %c0_116 = arith.constant 0 : index
      %187 = vector.load %arg10[%c0_114, %c0_115, %c0_116] : memref<1x8x32xf32, #tpu.memory_space<vmem>>, vector<1x8x32xf32>
      %188 = vector.shape_cast %187 : vector<1x8x32xf32> to vector<8x32xf32>
      %189 = vector.shape_cast %186 : vector<8x32xf32> to vector<1x8x32xf32>
      tpu.vector_store %arg10[%c0_114, %c0_115, %c0_116], %189 {strides = array<i32>} : memref<1x8x32xf32, #tpu.memory_space<vmem>>, vector<1x8x32xf32>,
    } else {
    }
    return
  }
  func.func @transform_0(%arg0: i32, %arg1: i32, %arg2: i32) -> (i32, i32, i32) {
    %c0_i32 = arith.constant 0 : i32
    %c0_i32_0 = arith.constant 0 : i32
    %c0_i32_1 = arith.constant 0 : i32
    return %arg0, %c0_i32, %c0_i32_0 : i32, i32, i32
  }
  func.func @transform_1(%arg0: i32, %arg1: i32, %arg2: i32) -> (i32, i32, i32) {
    %c0_i32 = arith.constant 0 : i32
    %c0_i32_0 = arith.constant 0 : i32
    %c0_i32_1 = arith.constant 0 : i32
    %c0_i32_2 = arith.constant 0 : i32
    return %c0_i32, %c0_i32_0, %c0_i32_1 : i32, i32, i32
  }
  func.func @transform_2(%arg0: i32, %arg1: i32, %arg2: i32) -> (i32, i32, i32) {
    %c0_i32 = arith.constant 0 : i32
    %c0_i32_0 = arith.constant 0 : i32
    %c0_i32_1 = arith.constant 0 : i32
    %c0_i32_2 = arith.constant 0 : i32
    return %c0_i32, %c0_i32_0, %c0_i32_1 : i32, i32, i32
  }
  func.func @transform_3(%arg0: i32, %arg1: i32, %arg2: i32) -> (i32, i32, i32) {
    %c0_i32 = arith.constant 0 : i32
    %c0_i32_0 = arith.constant 0 : i32
    %c0_i32_1 = arith.constant 0 : i32
    %c0_i32_2 = arith.constant 0 : i32
    return %c0_i32, %c0_i32_0, %c0_i32_1 : i32, i32, i32
  }
  func.func @transform_4(%arg0: i32, %arg1: i32, %arg2: i32) -> (i32, i32, i32) {
    %c0_i32 = arith.constant 0 : i32
    %c0_i32_0 = arith.constant 0 : i32
    %c0_i32_1 = arith.constant 0 : i32
    %c0_i32_2 = arith.constant 0 : i32
    return %c0_i32, %c0_i32_0, %c0_i32_1 : i32, i32, i32
  }
  func.func @transform_5(%arg0: i32, %arg1: i32, %arg2: i32) -> (i32, i32) {
    %c0_i32 = arith.constant 0 : i32
    %c0_i32_0 = arith.constant 0 : i32
    %c0_i32_1 = arith.constant 0 : i32
    return %c0_i32, %c0_i32_0 : i32, i32
  }
  func.func @transform_6(%arg0: i32, %arg1: i32, %arg2: i32) -> (i32, i32) {
    %c0_i32 = arith.constant 0 : i32
    %c0_i32_0 = arith.constant 0 : i32
    %c0_i32_1 = arith.constant 0 : i32
    return %c0_i32, %c0_i32_0 : i32, i32
  }
  func.func @transform_7(%arg0: i32, %arg1: i32, %arg2: i32) -> (i32, i32, i32) {
    %c0_i32 = arith.constant 0 : i32
    %c0_i32_0 = arith.constant 0 : i32
    %c0_i32_1 = arith.constant 0 : i32
    return %arg0, %c0_i32, %c0_i32_0 : i32, i32, i32
  }
}

</mosaic_0001>

<bundles_post_ra>
// kernel: tpu_custom_call.1
= control target key start
LH: loop header
LB: loop body
LE: loop exit
PB: predicated region body
PF: predicated region fallthrough
CT: control target
= control target key end

     0   :  { %s1782_s0 = inlined_call_operand.hbm [shape: f32[2,8,32], index: 0, kind: input, shape index: {}]   ;;  %s1783_s1 = inlined_call_operand.hbm [shape: f32[1,32,32], index: 1, kind: input, shape index: {}]   ;;  %s1784_s2 = inlined_call_operand.vmem [shape: f32[1,1,32], index: 2, kind: input, shape index: {}]   ;;  %s1785_s3 = inlined_call_operand.hbm [shape: f32[1,32,64], index: 3, kind: input, shape index: {}]   ;;  %s1786_s4 = inlined_call_operand.vmem [shape: f32[1,1,64], index: 4, kind: input, shape index: {}]   ;;  %s1787_s5 = inlined_call_operand.hbm [shape: f32[32,32], index: 5, kind: input, shape index: {}]   ;;  %s1788_s6 = inlined_call_operand.vmem [shape: f32[1,32], index: 6, kind: input, shape index: {}]   ;;  %s1789_s7 = inlined_call_operand.hbm [shape: f32[2,8,32], index: 7, kind: output, shape index: {}]  }
   0x1   :  { %1790 = sst [smem:[#allocation20_spill]] %s1783_s1 }
   0x2   :  { %1791 = sst [smem:[#allocation21_spill]] %s1785_s3 }
   0x3   :  { %12 = vsyncpa [#allocation8], 0 }
   0x4   :  { %14 = vsyncpa [#allocation8 + $0x1], 0 }
   0x5   :  { %15 = vsyncpa [#allocation11], 0 }
   0x6   :  { %16 = vsyncpa [#allocation14], 0 }
   0x7   :  { %17 = vsyncpa [#allocation9], 0 }
   0x8   :  { %19 = vsyncpa [#allocation9 + $0x1], 0  ;;  %s1510_s24 = smov 0   ;;  %s1512_s25 = smov 0  }
   0x9   :  { %s1514_s26 = smov 0   ;;  %s1516_s27 = smov 0  }
   0xa   :  { %s1518_s28 = smov 0   ;;  %s1520_s29 = smov 0  }
   0xb LB: > { %s1068_s30 = sadd.s32 4294967295, %s1450_s29   ;;  %p1070_p0 = scmp.ge.s32.totalorder %s1450_s29, 1  ;;  %s1450_s29 = sphi %s1520_s29, %s25_s29   ;;  %s1446_s28 = sphi %s1518_s28, %s1805_s28   ;;  %s1442_s27 = sphi %s1516_s27, %s1804_s27   ;;  %s1438_s26 = sphi %s1514_s26, %s1803_s26   ;;  %s1434_s25 = sphi %s1512_s25, %s1802_s25   ;;  %s1430_s24 = sphi %s1510_s24, %s1801_s24  }
   0xc   : > { %p1544_p1 = scmp.eq.s32.totalorder %s1068_s30, 0  ;;  %p227_p2 = scmp.lt.s32.totalorder %s1450_s29, 3 }
   0xd   : > { %s1793_s1 = sld [smem:[#allocation20_spill]]  ;;  %s1452_s13 = smov [#allocation10]  }
   0xe   : > { %p1552_p3 = pnand %p1070_p0, %p227_p2  ;;  %s240_s14 = sshll.u32 %s1452_s13, 4  ;;  %s241_s14 = int_to_ptr.vmem [resolvable:$true] %s240_s14 }
   0xf   : > { %p1074_p6 = scmp.ge.s32.totalorder %s1450_s29, 2  ;;  %s1796_s3 = sld [smem:[#allocation21_spill]] }
  0x10   : > { %p1118_p4 = pneg %p1552_p3  ;;  %s1453_s19 = smov 128  }
  0x11   : > { %s1454_s20 = smov 8   ;;  %s1455_s21 = smov [#allocation12]  }
  0x12   : > { %p1560_p5 = pnand %p1118_p4, %p1544_p1  ;;  %s257_s22 = sshll.u32 %s1455_s21, 4  ;;  %s258_s22 = int_to_ptr.vmem [resolvable:$true] %s257_s22 }
  0x13   : > { %s238_s11 = sshll.u32 %s1793_s1, 4  ;;  %s272_s10 = sshll.u32 %s1787_s5, 4  ;;  %s239_s11 = int_to_ptr.hbm [resolvable:$true] %s238_s11  ;;  %s273_s10 = int_to_ptr.hbm [resolvable:$true] %s272_s10 }
  0x14   : > { %1121 = dma.hbm_to_vmem [thread:$0]  (!%p1560_p5), %s239_s11, 512, %s241_s14, [#allocation11], %s1453_s19, %s1453_s19, %s1454_s20  }
  0x15   : > { %s255_s18 = sshll.u32 %s1796_s3, 4  ;;  %s1456_s13 = smov [#allocation13]   ;;  %s256_s18 = int_to_ptr.hbm [resolvable:$true] %s255_s18 }
  0x16   : > { %1124 = dma.hbm_to_vmem [thread:$0]  (!%p1560_p5), %s256_s18, 512, %s258_s22, [#allocation11], %s1453_s19, %s1453_s19, %s1454_s20  }
  0x17   : > { %s274_s16 = sshll.u32 %s1456_s13, 4  ;;  %s1069_s11 = sadd.s32 4294967294, %s1450_s29   ;;  %s275_s16 = int_to_ptr.vmem [resolvable:$true] %s274_s16 }
  0x18   : > { %1127 = dma.hbm_to_vmem [thread:$0]  (!%p1560_p5), %s273_s10, 512, %s275_s16, [#allocation14], %s1453_s19, %s1453_s19, %s1454_s20  }
  0x19   : > { %s44_s14 = sadd.s32 1, %s1446_s28  ;;  %s51_s17 = sadd.s32 1, %s1438_s26 }
  0x1a   : > { %p46_p7 = scmp.ge.s32.totalorder %s44_s14, 2  ;;  %p58_p8 = scmp.ne.s32.totalorder %s1438_s26, %s1434_s25 }
  0x1b   : > { %p59_p9 = scmp.eq.s32.totalorder %s1450_s29, 0  ;;  %p64_p10 = scmp.ne.s32.totalorder %s1434_s25, %s1430_s24 }
  0x1c   : > { %s1807_s14 = smov (%p46_p7, %s44_s14), 0  ;;  %p214_p13 = scmp.eq.s32.totalorder %s1068_s30, 1 }
  0x1d   : > { %p1587_p11 = por %p59_p9, %p58_p8  ;;  %p1593_p12 = por %p1544_p1, %p64_p10 }
  0x1e   : > { %s48_s19 = ssub.s32 %s1446_s28, %s1807_s14  ;;  %p220_p2 = scmp.eq.s32.totalorder %s1069_s11, 1 }
  0x1f   : > { %p49_p0 = scmp.eq.s32.totalorder %s48_s19, 0  ;;  %p1601_p4 = por %p214_p13, %p58_p8 }
  0x20   : > { %p1139_p5 = scmp.lt.s32.totalorder %s1450_s29, 2  ;;  %p1609_p7 = por %p220_p2, %p64_p10 }
  0x21   : > { %s1607_s21 = scalar_select %p49_p0, %s1438_s26, %s51_s17  }
  0x22   : > { %s291_s23 = sand.u32 1, %s1438_s26   ;;  %s1076_s10 = sshll.u32 %s1446_s28, 3 }
  0x23   : > { %s1075_s9 = sshll.u32 %s291_s23, 3  ;;  %s299_s30 = scalar_lea.hbm %s1782_s0, %s1076_s10 }
  0x24   : > { %s295_s19 = scalar_lea.vmem [#allocation7], %s1075_s9  ;;  %s301_s1 = sshll.u32 %s299_s30, 4  ;;  %s302_s1 = int_to_ptr.hbm [resolvable:$true] %s301_s1 }
  0x25   : > { %s303_s11 = sshll.u32 %s295_s19, 4  ;;  %p1129_p8 = pnand %p1139_p5, %p1587_p11  ;;  %s304_s11 = int_to_ptr.vmem [resolvable:$true] %s303_s11 }
  0x26   : > { %s292_s17 = scalar_lea.sflag [#allocation8], %s291_s23  ;;  %312 = sbr.rel (%p1552_p3) target bundleno = 1448 (0x5a8), region = 48 }
  0x27   : > { %1131 = dma.hbm_to_vmem [thread:$0]  (!%p1129_p8), %s302_s1, 128, %s304_s11, %s292_s17  }
  0x28   : > { %s1623_s3 = sand.u32 (!%p1552_p3), 1, %s1434_s25  }
  0x29   : > { %s1078_s10 = sshll.u32 (!%p1552_p3), %s1623_s3, 3  ;;  %s315_s9 = scalar_lea.sflag (!%p1552_p3), [#allocation8], %s1623_s3 }
  0x2a   : > { %s318_s13 = scalar_lea.vmem (!%p1552_p3), [#allocation7], %s1078_s10 }
  0x2b   : > { %1413 = dma.done.wait (%p1593_p12), %s315_s9, 128  }
  0x2c   : > { %1415 = vsyncadd (%p1593_p12), %s315_s9, 4294967168 }
  0x2d   : > { %1417 = dma.done.wait (%p1544_p1), [#allocation11], 1024  }
  0x2e   : > { %1419 = vsyncadd (%p1544_p1), [#allocation11], 4294966272 }
  0x2f   : > { %1421 = dma.done.wait (%p1544_p1), [#allocation14], 512  }
  0x30   : > { %1423 = vsyncadd (%p1544_p1), [#allocation14], 4294966784  ;;  %v375_v0 = vld [vmem:[#allocation10 + $0x18] sm:$0xff]  ;;  %v374_v2 = vld [vmem:[#allocation10 + $0x10] sm:$0xff]  ;;  %vm381_vm0 = vcmask 261120   ;;  %vm416_vm1 = vcmask 64512   ;;  %v459_v24 = vlaneseq }
  0x31   : > { %v429_v1 = vld [vmem:[#allocation12 + $0x18] sm:$0xff]  ;;  %397 = vmatpush.msra.mxu0 %v375_v0  ;;  %v428_v3 = vld [vmem:[#allocation12 + $0x10] sm:$0xff]  ;;  %v373_v4 = vld [vmem:[#allocation10 + $0x8] sm:$0xff]  ;;  %s1457_s15 = smov 96   ;;  %s1458_s23 = smov 120   ;;  %vm407_vm2 = vcmask 7168  }
  0x32   : > { %451 = vmatpush.msra.mxu1 %v429_v1  ;;  %v427_v5 = vld [vmem:[#allocation12 + $0x8] sm:$0xff]  ;;  %v372_v6 = vld [vmem:[#allocation10] sm:$0xff]  ;;  %v369_v8 = vld [vmem:[%s318_s13] sm:$0xff]  ;;  %s1459_s16 = smov 104   ;;  %s1460_s30 = smov 112   ;;  %v1461_v19 = vmov -inf  }
  0x33   : > { %398 = vmatpush.msra.mxu0 %v374_v2  ;;  %v426_v7 = vld [vmem:[#allocation12] sm:$0xff]  ;;  %408 = vst.msk [vmem:[#allocation3] sm:$0xff] %vm407_vm2, %v1461_v19  ;;  %v460_v25 = vshrl.u32 %v459_v24, 7  ;;  %v462_v26 = vand.u32 127, %v459_v24  ;;  %v1462_v31 = vmov 0   ;;  %v1463_v32 = vmov 0.0  }
  0x34   : > { %452 = vmatpush.msra.mxu1 %v428_v3  ;;  %v1213_v9 = vld [vmem:[%s1784_s2] ss:$0 sm:$0xff]  ;;  %409 = vst.msk [vmem:[#allocation3 + $0x8] sm:$0xff] %vm407_vm2, %v1461_v19  ;;  %1210 = vset.pattern.permute.xlu0 %v1462_v31  ;;  %s1464_s19 = smov 88   ;;  %s1465_s11 = smov 80   ;;  %vm886_vm4 = vcmask 130048  }
  0x35   : > { %399 = vmatpush.msra.mxu0 %v373_v4  ;;  %v1214_v10 = vld [vmem:[%s1786_s4] ss:$0 sm:$0xff]  ;;  %410 = vst.msk [vmem:[#allocation3 + $0x10] sm:$0xff] %vm407_vm2, %v1461_v19  ;;  %vm465_vm3 = vcmp.gt.s32.totalorder %v462_v26, %v460_v25  ;;  %1211 = vset.pattern.permute.xlu2 %v1462_v31  ;;  %s1466_s17 = smov 72   ;;  %s1467_s9 = smov 16   ;;  %vm888_vm5 = vcmask 195584  }
  0x36   : > { %453 = vmatpush.msra.mxu1 %v427_v5  ;;  %411 = vst.msk [vmem:[#allocation3 + $0x18] sm:$0xff] %vm407_vm2, %v1461_v19  ;;  %1212 = vset.pattern.permute.xlu1 %v1462_v31  ;;  %s1468_s13 = smov 8   ;;  %s1469_s1 = smov 24  }
  0x37   : > { %400 = vmatpush.msra.mxu0 %v372_v6  ;;  %414 = vst.msk [vmem:[#allocation4 + $0x10] sm:$0xff] %vm407_vm2, %v1463_v32  ;;  %s1099_s8 = sshll.u32 %s1442_s27, 3  ;;  %s933_s27 = scalar_lea.sflag [#allocation9], %s1623_s3 }
  0x38   : > { %454 = vmatpush.msra.mxu1 %v426_v7  ;;  %1083 = vmatmul.msk.f32.vlgmr.msra.gmra.mxu0 %vm381_vm0, %v369_v8  ;;  %412 = vst.msk [vmem:[#allocation4] sm:$0xff] %vm407_vm2, %v1463_v32 }
  0x39   : > { %1084 = vmatmul.msk.f32.vlgmr.msra.gmra.mxu1 %vm381_vm0, %v369_v8  ;;  %413 = vst.msk [vmem:[#allocation4 + $0x8] sm:$0xff] %vm407_vm2, %v1463_v32 }
  0x3a   : > { %415 = vst.msk [vmem:[#allocation4 + $0x18] sm:$0xff] %vm407_vm2, %v1463_v32  ;;  %v1676_v33 = vld [vmem:[#allocation3] sm:$0xff] }
  0x3b   : > { %417 = vst.msk [vmem:[#allocation5] sm:$0xff] %vm416_vm1, %v1463_v32  ;;  %v587_v55 = vld [vmem:[#allocation3 + $0x8] sm:$0xff] }
  0x3c   : > { %418 = vst.msk [vmem:[#allocation5 + $0x8] sm:$0xff] %vm416_vm1, %v1463_v32  ;;  %v1692_v44 = vld [vmem:[#allocation3 + $0x10] sm:$0xff] }
  0x3d   : > { %419 = vst.msk [vmem:[#allocation5 + $0x10] sm:$0xff] %vm416_vm1, %v1463_v32  ;;  %v773_v59 = vld [vmem:[#allocation3 + $0x18] sm:$0xff] }
  0x3e   : > { %420 = vst.msk [vmem:[#allocation5 + $0x18] sm:$0xff] %vm416_vm1, %v1463_v32  ;;  %v697_v24 = vld [vmem:[#allocation4 + $0x10] sm:$0xff] }
  0x40   : > { %v604_v31 = vld [vmem:[#allocation4 + $0x8] sm:$0xff] }
  0xb5   : > { %v402_v11 = vpop.f32.mrf.mxu0 }
  0xb6   : > { %v456_v12 = vpop.f32.mrf.mxu1  ;;  %v403_v13 = vadd.f32 %v1213_v9, %v402_v11 }
  0xb7   : > { %v1649_v14 = vadd.f32 %v1214_v10, %v456_v12 }
  0xb8   : > { %v405_v15 = vmul.f32 0.35355338, %v403_v13 }
  0xb9   : > { %526 = vrot.lane.b32.xlu1 %v1649_v14, %s1457_s15  ;;  %1085 = vmatpush.xpose.msk.msra.mxu2 %vm416_vm1, %v1649_v14  ;;  %s943_s15 = scalar_lea.hbm %s1789_s7, %s1099_s8 }
  0xba   : > { %406 = vst.msk [vmem:[#allocation2] sm:$0xff] %vm381_vm0, %v405_v15 }
  0xc1   : > { %559 = vrot.lane.b32.xlu1 %v1649_v14, %s1458_s23  ;;  %v555_v16 = vld [vmem:[#allocation2] sm:$0xff] }
  0xc2   : > { %557 = vrot.lane.b32.xlu2 %v555_v16, %s1458_s23  ;;  %1086 = vmatmul.msk.f32.vlgmr.msra.gmra.mxu2 %vm416_vm1, %v555_v16 }
  0xc9   : > { %743 = vrot.lane.b32.xlu1 %v555_v16, %s1459_s16 }
  0xca   : > { %745 = vrot.lane.b32.xlu2 %v1649_v14, %s1459_s16 }
  0xd1   : > { %650 = vrot.lane.b32.xlu1 %v555_v16, %s1460_s30 }
  0xd2   : > { %652 = vrot.lane.b32.xlu2 %v1649_v14, %s1460_s30  ;;  %s364_s30 = scalar_lea.vmem [#allocation15], %s1078_s10  ;;  %s1380_s10 = scalar_lea.hbm %s1789_s7, 16 }
 0x11c   : > { %v558_v17 = vpop.permute.xlu2 %557 }
 0x124   : > { %v746_v18 = vpop.permute.xlu2 %745 }
 0x12b   : > { %v527_v20 = vpop.permute.xlu1 %526 }
 0x12c   : > { %547 = vmatpush.msra.mxu3 %v527_v20  ;;  %v653_v21 = vpop.permute.xlu2 %652 }
 0x12d   : > { %1091 = vmatpush.xpose.msk.msrb.mxu0 %vm416_vm1, %v653_v21 }
 0x133   : > { %v560_v22 = vpop.permute.xlu1 %559 }
 0x134   : > { %1088 = vmatpush.xpose.msk.msrb.mxu3 %vm416_vm1, %v560_v22 }
 0x13b   : > { %v744_v23 = vpop.permute.xlu1 %743 }
 0x143   : > { %v651_v27 = vpop.permute.xlu1 %650 }
 0x144   : > { %1092 = vmatmul.msk.f32.vlgmr.msrb.gmra.mxu0 %vm416_vm1, %v651_v27 }
 0x145   : > { %v491_v28 = vpop.f32.mrf.mxu2 }
 0x146   : > { %v494_v29 = vsel %vm465_vm3, -inf, %v491_v28 }
 0x147   : > { %v496_v30 = vsel %vm416_vm1, %v494_v29, -inf }
 0x148   : > { %497 = vmax.xlane.f32.xlu0 %v496_v30 }
 0x1bb   : > { %v498_v34 = vpop.xlane.xlu0 %497 }
 0x1bc   : > { %v1679_v35 = vmax.f32 %v1676_v33, %v498_v34 }
 0x1be   : > { %v500_v36 = vsub.f32 %v1676_v33, %v1679_v35  ;;  %554 = vst.msk [vmem:[#allocation3] sm:$0xff] %vm407_vm2, %v1679_v35  ;;  %505 = vperm.xlu0 %1210, %v1679_v35  }
 0x1c0   : > { %v501_v30 = vmul.f32 1.442695, %v500_v36 }
 0x1c1   : > { %v675_v37 = vpop.f32.mrf.mxu0 }
 0x1c2   : > { %v678_v38 = vsel %vm465_vm3, -inf, %v675_v37 }
 0x1c3   : > { %v681_v39 = vsel %vm416_vm1, %v678_v38, -inf }
 0x1e8   : > { %682 = vmax.xlane.f32.xlu0 %v681_v39  ;;  %v511_v39 = vld [vmem:[#allocation4] sm:$0xff] }
 0x230   : > { %v506_v40 = vpop.permute.xlu0 %505 }
 0x231   : > { %v508_v41 = vsub.f32 %v494_v29, %v506_v40 }
 0x233   : > { %v509_v42 = vmul.f32 1.442695, %v508_v41 }
 0x235   : > { %1216 = vpow2.f32 %v509_v42 }
 0x23b   : > { %v1217_v43 = vpop.eup %1216 }
 0x23c   : > { %1087 = vmatmul.msk.f32.vlgmr.msra.gmra.mxu3 %vm416_vm1, %v1217_v43  ;;  %v513_v13 = vsel %vm416_vm1, %v1217_v43, 0.0 }
 0x23d   : > { %1094 = vmatpush.xpose.msk.msra.mxu3 %vm416_vm1, %v746_v18 }
 0x244   : > { %1089 = vmatmul.msk.f32.vlgmr.msrb.gmra.mxu3 %vm416_vm1, %v558_v17 }
 0x24c   : > { %1095 = vmatmul.msk.f32.vlgmr.msra.gmra.mxu3 %vm416_vm1, %v744_v23 }
 0x25b   : > { %v683_v45 = vpop.xlane.xlu0 %682 }
 0x25c   : > { %v1695_v46 = vmax.f32 %v1692_v44, %v683_v45 }
 0x25e   : > { %v685_v47 = vsub.f32 %v1692_v44, %v1695_v46  ;;  %740 = vst.msk [vmem:[#allocation3 + $0x10] sm:$0xff] %vm407_vm2, %v1695_v46  ;;  %690 = vperm.xlu0 %1210, %v1695_v46   ;;  %v612_v44 = vld [vmem:[#allocation5 + $0x8] sm:$0xff] }
 0x260   : > { %v686_v22 = vmul.f32 1.442695, %v685_v47 }
 0x2bf   : > { %v1702_v48 = vpop.f32.mrf.mxu3 }
 0x2c7   : > { %v582_v49 = vpop.f32.mrf.mxu3 }
 0x2c8   : > { %v585_v50 = vsel %vm465_vm3, -inf, %v582_v49 }
 0x2c9   : > { %v588_v51 = vsel %vm416_vm1, %v585_v50, -inf }
 0x2ca   : > { %589 = vmax.xlane.f32.xlu2 %v588_v51 }
 0x2cf   : > { %v768_v52 = vpop.f32.mrf.mxu3 }
 0x2d0   : > { %v771_v53 = vsel %vm465_vm3, -inf, %v768_v52  ;;  %v691_v63 = vpop.permute.xlu0 %690 }
 0x2d1   : > { %v774_v54 = vsel %vm416_vm1, %v771_v53, -inf  ;;  %v693_v0 = vsub.f32 %v678_v38, %v691_v63 }
 0x2d2   : > { %775 = vmax.xlane.f32.xlu1 %v774_v54 }
 0x2d3   : > { %v694_v1 = vmul.f32 1.442695, %v693_v0 }
 0x2d5   : > { %1218 = vpow2.f32 %v694_v1 }
 0x2db   : > { %v1219_v2 = vpop.eup %1218 }
 0x2dc   : > { %v699_v3 = vsel %vm416_vm1, %v1219_v2, 0.0 }
 0x33d   : > { %v590_v56 = vpop.xlane.xlu2 %589 }
 0x33e   : > { %v591_v57 = vmax.f32 %v587_v55, %v590_v56 }
 0x340   : > { %v592_v58 = vsub.f32 %v587_v55, %v591_v57  ;;  %647 = vst.msk [vmem:[#allocation3 + $0x8] sm:$0xff] %vm407_vm2, %v591_v57  ;;  %597 = vperm.xlu2 %1211, %v591_v57   ;;  %v798_v55 = vld [vmem:[#allocation5 + $0x18] sm:$0xff] }
 0x342   : > { %v593_v4 = vmul.f32 1.442695, %v592_v58 }
 0x344   : > { %1220 = vpow2.f32 %v593_v4 }
 0x345   : > { %v776_v60 = vpop.xlane.xlu1 %775 }
 0x346   : > { %v777_v61 = vmax.f32 %v773_v59, %v776_v60 }
 0x348   : > { %v778_v62 = vsub.f32 %v773_v59, %v777_v61  ;;  %833 = vst.msk [vmem:[#allocation3 + $0x18] sm:$0xff] %vm407_vm2, %v777_v61  ;;  %783 = vperm.xlu1 %1212, %v777_v61   ;;  %619 = vrot.lane.b32.xlu2 %v1649_v14, %s1464_s19  ;;  %v705_v61 = vld [vmem:[#allocation5 + $0x10] sm:$0xff]  ;;  %s945_s19 = sshll.u32 %s364_s30, 4  ;;  %s946_s19 = int_to_ptr.vmem [resolvable:$true] %s945_s19 }
 0x34a   : > { %v1221_v5 = vpop.eup %1220  ;;  %v779_v16 = vmul.f32 1.442695, %v778_v62 }
 0x34b   : > { %v605_v32 = vmul.f32 %v1221_v5, %v604_v31 }
 0x350   : > { %712 = vrot.lane.b32.xlu1 %v1649_v14, %s1465_s11  ;;  %805 = vrot.lane.b32.xlu2 %v1649_v14, %s1466_s17  ;;  %s947_s11 = sshll.u32 %s943_s15, 4  ;;  %s948_s11 = int_to_ptr.hbm [resolvable:$true] %s947_s11 }
 0x351   : > { %s1374_s17 = sshra.s32 %s948_s11, 4  ;;  %s1375_s17 = int_to_ptr.hbm [resolvable:$true] %s1374_s17 }
 0x352   : > { %p1381_p10 = scmp.lt.s32.totalorder %s1375_s17, %s1789_s7 }
 0x37a   : > { %700 = vadd.xlane.f32.xlu1 %v699_v3 }
 0x393   : > { %615 = vperm.xlu1 %1212, %v1221_v5  }
 0x39a   : > { %v598_v6 = vpop.permute.xlu2 %597 }
 0x39b   : > { %v600_v7 = vsub.f32 %v585_v50, %v598_v6  ;;  %v790_v50 = vld [vmem:[#allocation4 + $0x18] sm:$0xff] }
 0x39d   : > { %v601_v8 = vmul.f32 1.442695, %v600_v7 }
 0x39f   : > { %1222 = vpow2.f32 %v601_v8  ;;  %v519_v8 = vld [vmem:[#allocation5] sm:$0xff] }
 0x3a2   : > { %v620_v9 = vpop.permute.xlu2 %619 }
 0x3a3   : > { %640 = vmatpush.msrb.mxu2 %v620_v9 }
 0x3a5   : > { %v1223_v10 = vpop.eup %1222 }
 0x3a6   : > { %1090 = vmatmul.msk.f32.vlgmr.msrb.gmra.mxu2 %vm416_vm1, %v1223_v10  ;;  %v606_v11 = vsel %vm416_vm1, %v1223_v10, 0.0 }
 0x3a7   : > { %607 = vadd.xlane.f32.xlu2 %v606_v11 }
 0x3aa   : > { %v806_v12 = vpop.permute.xlu2 %805 }
 0x3ab   : > { %826 = vmatpush.msra.mxu2 %v806_v12 }
 0x3af   : > { %514 = vadd.xlane.f32.xlu2 %v513_v13 }
 0x3ba   : > { %v784_v14 = vpop.permute.xlu1 %783 }
 0x3bb   : > { %v786_v15 = vsub.f32 %v771_v53, %v784_v14 }
 0x3bd   : > { %v787_v17 = vmul.f32 1.442695, %v786_v15  ;;  %v906_v15 = vld [vmem:[#allocation13 + $0x18] sm:$0xff] }
 0x3be   : > { %922 = vmatpush.msra.mxu0 %v906_v15 }
 0x3bf   : > { %1224 = vpow2.f32 %v787_v17  ;;  %v904_v17 = vld [vmem:[#allocation13 + $0x8] sm:$0xff] }
 0x3c0   : > { %1226 = vpow2.f32 %v779_v16  ;;  %v905_v16 = vld [vmem:[#allocation13 + $0x10] sm:$0xff] }
 0x3c1   : > { %1228 = vpow2.f32 %v686_v22  ;;  %923 = vmatpush.msra.mxu0 %v905_v16 }
 0x3c2   : > { %v713_v18 = vpop.permute.xlu1 %712 }
 0x3c3   : > { %733 = vmatpush.msrb.mxu1 %v713_v18  ;;  %v903_v18 = vld [vmem:[#allocation13] sm:$0xff]  ;;  %924 = vmatpush.msra.mxu0 %v904_v17 }
 0x3c4   : > { %1093 = vmatmul.msk.f32.vlgmr.msrb.gmra.mxu1 %vm416_vm1, %v1219_v2 }
 0x3c5   : > { %v1225_v19 = vpop.eup %1224  ;;  %925 = vmatpush.msra.mxu0 %v903_v18 }
 0x3c6   : > { %v1227_v20 = vpop.eup %1226  ;;  %1096 = vmatmul.msk.f32.vlgmr.msra.gmra.mxu2 %vm416_vm1, %v1225_v19  ;;  %v792_v21 = vsel %vm416_vm1, %v1225_v19, 0.0 }
 0x3c7   : > { %801 = vperm.xlu2 %1211, %v1227_v20   ;;  %793 = vadd.xlane.f32.xlu0 %v792_v21  ;;  %v1229_v23 = vpop.eup %1228  ;;  %v791_v51 = vmul.f32 %v1227_v20, %v790_v50 }
 0x3c8   : > { %v698_v25 = vmul.f32 %v1229_v23, %v697_v24 }
 0x3db   : > { %708 = vperm.xlu0 %1210, %v1229_v23  }
 0x3ed   : > { %v701_v26 = vpop.xlane.xlu1 %700 }
 0x3ee   : > { %v702_v27 = vadd.f32 %v701_v26, %v698_v25 }
 0x3f0   : > { %703 = vst.msk [vmem:[#allocation4 + $0x10] sm:$0xff] %vm407_vm2, %v702_v27 }
 0x3f7   : > { %v856_v28 = vld [vmem:[#allocation4 + $0x10] sm:$0xff] }
 0x3f8   : > { %1230 = vrcp.f32 %v856_v28  ;;  %v1215_v28 = vld [vmem:[%s1788_s6] ss:$0 sm:$0xff] }
 0x3f9   : > { %1232 = vpow2.f32 %v501_v30 }
 0x3fe   : > { %v1231_v29 = vpop.eup %1230 }
 0x3ff   : > { %860 = vperm.xlu1 %1212, %v1231_v29   ;;  %v1233_v38 = vpop.eup %1232 }
 0x400   : > { %v512_v40 = vmul.f32 %v1233_v38, %v511_v39 }
 0x405   : > { %v616_v45 = vpop.permute.xlu1 %615 }
 0x406   : > { %v618_v33 = vmul.f32 %v616_v45, %v612_v44 }
 0x41a   : > { %v608_v34 = vpop.xlane.xlu2 %607 }
 0x41b   : > { %v609_v37 = vadd.f32 %v608_v34, %v605_v32 }
 0x41d   : > { %610 = vst.msk [vmem:[#allocation4 + $0x8] sm:$0xff] %vm407_vm2, %v609_v37 }
 0x422   : > { %v515_v41 = vpop.xlane.xlu2 %514 }
 0x423   : > { %v516_v42 = vadd.f32 %v515_v41, %v512_v40 }
 0x424   : > { %v847_v43 = vld [vmem:[#allocation4 + $0x8] sm:$0xff] }
 0x425   : > { %518 = vst.msk [vmem:[#allocation4] sm:$0xff] %vm407_vm2, %v516_v42  ;;  %1234 = vrcp.f32 %v847_v43 }
 0x429   : > { %v642_v35 = vpop.f32.mrf.mxu2 }
 0x42a   : > { %v645_v36 = vadd.f32 %v642_v35, %v618_v33  ;;  %v802_v56 = vpop.permute.xlu2 %801 }
 0x42b   : > { %v1235_v46 = vpop.eup %1234  ;;  %v804_v57 = vmul.f32 %v802_v56, %v798_v55 }
 0x42c   : > { %646 = vst.msk [vmem:[#allocation5 + $0x8] sm:$0xff] %vm416_vm1, %v645_v36  ;;  %851 = vperm.xlu0 %1210, %v1235_v46   ;;  %v838_v47 = vld [vmem:[#allocation4] sm:$0xff] }
 0x42d   : > { %1236 = vrcp.f32 %v838_v47 }
 0x433   : > { %v1237_v49 = vpop.eup %1236  ;;  %v846_v5 = vld [vmem:[#allocation5 + $0x8] sm:$0xff] }
 0x434   : > { %522 = vperm.xlu0 %1210, %v1233_v38   ;;  %842 = vperm.xlu1 %1212, %v1237_v49  }
 0x43a   : > { %v794_v52 = vpop.xlane.xlu0 %793 }
 0x43b   : > { %v795_v53 = vadd.f32 %v794_v52, %v791_v51 }
 0x43d   : > { %796 = vst.msk [vmem:[#allocation4 + $0x18] sm:$0xff] %vm407_vm2, %v795_v53 }
 0x441   : > { %v735_v0 = vpop.f32.mrf.mxu1 }
 0x444   : > { %v865_v54 = vld [vmem:[#allocation4 + $0x18] sm:$0xff] }
 0x445   : > { %1238 = vrcp.f32 %v865_v54 }
 0x449   : > { %v828_v58 = vpop.f32.mrf.mxu2 }
 0x44a   : > { %v831_v59 = vadd.f32 %v828_v58, %v804_v57 }
 0x44b   : > { %v1239_v60 = vpop.eup %1238 }
 0x44c   : > { %832 = vst.msk [vmem:[#allocation5 + $0x18] sm:$0xff] %vm416_vm1, %v831_v59  ;;  %869 = vperm.xlu2 %1211, %v1239_v60  }
 0x44d   : > { %v709_v62 = vpop.permute.xlu0 %708 }
 0x44e   : > { %v711_v63 = vmul.f32 %v709_v62, %v705_v61 }
 0x450   : > { %v738_v1 = vadd.f32 %v735_v0, %v711_v63 }
 0x452   : > { %739 = vst.msk [vmem:[#allocation5 + $0x10] sm:$0xff] %vm416_vm1, %v738_v1 }
 0x453   : > { %v864_v9 = vld [vmem:[#allocation5 + $0x18] sm:$0xff] }
 0x459   : > { %v855_v2 = vld [vmem:[#allocation5 + $0x10] sm:$0xff] }
 0x471   : > { %v861_v3 = vpop.permute.xlu1 %860 }
 0x472   : > { %v863_v4 = vmul.f32 %v861_v3, %v855_v2 }
 0x474   : > { %878 = vrot.lane.b32.xlu0 %v863_v4, %s1467_s9  ;;  %s1376_s9 = scalar_lea.hbm %s1375_s17, 8 }
 0x475   : > { %p1377_p1 = scmp.ne.s32.totalorder %s1375_s17, %s1376_s9  ;;  %p1382_p11 = scmp.lt.s32.totalorder %s1380_s10, %s1376_s9 }
 0x477   : > { %p1378_p3 = pnand %p1377_p1, %p1601_p4  ;;  %p1383_p12 = por %p1382_p11, %p1381_p10 }
 0x479   : > { %p1379_p9 = pneg %p1378_p3 }
 0x47b   : > { %p1384_p13 = pnand %p1383_p12, %p1379_p9 }
 0x49e   : > { %v852_v6 = vpop.permute.xlu0 %851 }
 0x49f   : > { %v854_v7 = vmul.f32 %v852_v6, %v846_v5 }
 0x4a1   : > { %874 = vrot.lane.b32.xlu2 %v854_v7, %s1468_s13 }
 0x4a6   : > { %v870_v10 = vpop.permute.xlu2 %869  ;;  %v523_v11 = vpop.permute.xlu0 %522 }
 0x4a7   : > { %v872_v12 = vmul.f32 %v870_v10, %v864_v9  ;;  %v525_v13 = vmul.f32 %v523_v11, %v519_v8  ;;  %v843_v20 = vpop.permute.xlu1 %842 }
 0x4a9   : > { %v552_v14 = vadd.f32 %v1702_v48, %v525_v13  ;;  %882 = vrot.lane.b32.xlu1 %v872_v12, %s1469_s1 }
 0x4ab   : > { %553 = vst.msk [vmem:[#allocation5] sm:$0xff] %vm416_vm1, %v552_v14 }
 0x4b2   : > { %v837_v19 = vld [vmem:[#allocation5] sm:$0xff] }
 0x4b3   : > { %v845_v22 = vmul.f32 %v843_v20, %v837_v19 }
 0x4e6   : > { %v879_v23 = vpop.permute.xlu0 %878 }
 0x4fb   : > { %v875_v21 = vpop.permute.xlu2 %874 }
 0x4fc   : > { %v885_v48 = vsel %vm416_vm1, %v845_v22, %v875_v21 }
 0x4fd   : > { %v887_v24 = vsel %vm886_vm4, %v885_v48, %v879_v23 }
 0x51b   : > { %v883_v25 = vpop.permute.xlu1 %882 }
 0x51c   : > { %v889_v26 = vsel %vm888_vm5, %v887_v24, %v883_v25 }
 0x51d   : > { %892 = vst.msk [vmem:[#allocation6] sm:$0xff] %vm381_vm0, %v889_v26 }
 0x524   : > { %v902_v27 = vld [vmem:[#allocation6] sm:$0xff] }
 0x525   : > { %1097 = vmatmul.msk.f32.vlgmr.msra.gmra.mxu0 %vm381_vm0, %v902_v27 }
 0x5a2   : > { %v927_v29 = vpop.f32.mrf.mxu0 }
 0x5a3   : > { %v930_v30 = vadd.f32 %v1215_v28, %v927_v29 }
 0x5a5   : > { %931 = vst.msk [vmem:[%s364_s30] sm:$0xff] %vm381_vm0, %v930_v30 }
 0x5a6   : > { %1387 = shalt.err (!%p1384_p13)
}
 0x5a7   : > { %1116 = dma.vmem_to_hbm [thread:$0]  (%p1601_p4), %s946_s19, 128, %s948_s11, %s933_s27  }
 0x5a8 PF: > { %s959_s3 = sand.u32 1, %s1430_s24   ;;  %p1133_p0 = pnand %p1074_p6, %p1609_p7 }
 0x5a9   : > { %s960_s18 = scalar_lea.sflag [#allocation9], %s959_s3 }
 0x5aa   : > { %p1134_p2 = pneg %p1133_p0 }
 0x5ac   : > { %1425 = dma.done.wait (%p1134_p2), %s960_s18, 128  }
 0x5ad   : > { %1427 = vsyncadd (%p1134_p2), %s960_s18, 4294967168  ;;  %s25_s29 = sadd.s32 1, %s1450_s29   ;;  %s1801_s24 = smov %s1434_s25 }
 0x5ae   : > { %p22_p5 = scmp.ge.s32.totalorder %s25_s29, 4   ;;  %s1802_s25 = smov %s1438_s26 }
 0x5af   : > { %s1803_s26 = smov %s1607_s21  ;;  %s1804_s27 = smov %s1446_s28 }
 0x5b0   : > { %s1805_s28 = smov %s1807_s14  ;;  %24 = sbr.rel (!%p22_p5) target bundleno = 11 (0xb), region = 132 }
 0x5b5   :  { %966 = vsyncpa [#allocation8], 1 }
 0x5b6   :  { %968 = vsyncpa [#allocation8 + $0x1], 1 }
 0x5b7   :  { %969 = vsyncpa [#allocation11], 1 }
 0x5b8   :  { %970 = vsyncpa [#allocation14], 1 }
 0x5b9   :  { %971 = vsyncpa [#allocation9], 1 }
 0x5ba   :  { %973 = vsyncpa [#allocation9 + $0x1], 1 }

</bundles_post_ra>
